<compile_context>
chip_gen: v5e
topology: v5e:2x2
jax: 0.10.0
libtpu: 0.0.40
codegen_flags: <defaults>
</compile_context>

<pallas_src>
import math

import jax
import jax.numpy as jnp
from jax.experimental import pallas as pl
from jax.experimental.pallas import tpu as pltpu


def _softplus(x):
    # Stable softplus: max(x, 0) + log(1 + exp(-|x|)).
    # (log1p would be marginally more precise, but the difference (~1e-7 at
    # rho ~= -6.9) is far below the deliberate bf16 quantization of W.)
    return jnp.maximum(x, 0.0) + jnp.log(1.0 + jnp.exp(-jnp.abs(x)))


def _round_up(x, m):
    return ((x + m - 1) // m) * m


# -----------------------------------------------------------------------------
# 1) Per-layer reparameterization sampling: tiny Pallas pre-pass run ONCE per
#    forward.  W -> bf16 (MXU operand dtype), b -> f32.
# -----------------------------------------------------------------------------
def _sample_layer_kernel(wmu, wrho, wew, bmu, brho, beb, w_out, b_out):
    w_out[...] = (wmu[...] + _softplus(wrho[...]) * wew[...]).astype(w_out.dtype)
    b_out[...] = (bmu[...] + _softplus(brho[...]) * beb[...]).astype(b_out.dtype)


def _sample_layer(p):
    in_dim, out_dim = p["w_mu"].shape
    return pl.pallas_call(
        _sample_layer_kernel,
        out_shape=(jax.ShapeDtypeStruct((in_dim, out_dim), jnp.bfloat16),
                   jax.ShapeDtypeStruct((1, out_dim), jnp.float32)),
    )(p["w_mu"], p["w_rho"], p["eps_w"], p["b_mu"], p["b_rho"], p["eps_b"])


# -----------------------------------------------------------------------------
# 2) Decoder MLP kernel: 4 x (bf16 MXU dot, f32 accum, f32 bias, ReLU), with
#    bf16 activations carried between layers.
# -----------------------------------------------------------------------------
def _decoder_kernel(z_ref,
                    w0, b0, w1, b1, w2, b2, w3, b3,
                    out_ref):
    h = z_ref[...].astype(jnp.bfloat16)
    y = None
    for w_ref, b_ref, relu in ((w0, b0, True), (w1, b1, True),
                               (w2, b2, True), (w3, b3, False)):
        y = jnp.dot(h, w_ref[...], preferred_element_type=jnp.float32)
        y = y + b_ref[...]                                   # f32 bias add (VPU)
        if relu:
            h = jnp.maximum(y, 0.0).astype(jnp.bfloat16)     # bf16 between layers
    out_ref[...] = y.astype(out_ref.dtype)


def _decoder_call(z_p, ws_p, bs_p, dims_p, tile, n_tiles, vmem_limit,
                  single_buffer_weights):
    def _w_spec(shape):
        # Weights never change across batch tiles (constant index_map).  With
        # single buffering, double-buffering does not double their footprint.
        if single_buffer_weights:
            return pl.BlockSpec(shape, lambda i: (0, 0),
                                pipeline_mode=pl.Buffered(1))
        return pl.BlockSpec(shape, lambda i: (0, 0))

    in_specs = [pl.BlockSpec((tile, dims_p[0]), lambda i: (i, 0))]
    flat_args = [z_p]
    for w, b in zip(ws_p, bs_p):
        in_specs += [_w_spec(w.shape), _w_spec(b.shape)]
        flat_args += [w, b]

    return pl.pallas_call(
        _decoder_kernel,
        out_shape=jax.ShapeDtypeStruct((tile * n_tiles, dims_p[-1]), jnp.float32),
        grid_spec=pltpu.PrefetchScalarGridSpec(
            num_scalar_prefetch=0,
            grid=(n_tiles,),
            in_specs=in_specs,
            out_specs=pl.BlockSpec((tile, dims_p[-1]), lambda i: (i, 0)),
        ),
        compiler_params=pltpu.CompilerParams(
            # Batch tiles are independent.  Note: on v7x, batch-sharding across
            # TCs re-DMAs the weights per core; with the large tile_m used here
            # n_tiles is 1-2 so this is effectively single-core anyway.
            dimension_semantics=("parallel",),
            vmem_limit_bytes=vmem_limit,
        ),
    )(*flat_args)


def decoder_forward(z, layer_params, *, tile_m=512):
    """DecoderNetwork.forward for the current task.

    z: (B, latent) f32.
    layer_params: 4 dicts (task0, task1, shared0, shared1) each with keys
      w_mu / w_rho / eps_w of shape (in, out) and b_mu / b_rho / eps_b of
      shape (1, out), all f32.
    Returns x_logits: (B, output) f32.
    """
    B, latent = z.shape
    out_dims = [p["w_mu"].shape[1] for p in layer_params]

    # --- sample W (bf16) / b (f32) once per forward --------------------------
    sampled = [_sample_layer(p) for p in layer_params]

    # --- pad to lane/sublane-aligned shapes (50->128, 500->512, 784->896) ----
    dims_p = [_round_up(d, 128) for d in [latent] + out_dims]
    ws_p, bs_p = [], []
    for i, (w, b) in enumerate(sampled):
        ws_p.append(jnp.pad(w, ((0, dims_p[i] - w.shape[0]),
                                (0, dims_p[i + 1] - w.shape[1]))))
        bs_p.append(jnp.pad(b, ((0, 0), (0, dims_p[i + 1] - b.shape[1]))))

    tile = min(tile_m, _round_up(B, 8))      # whole batch in one step if it fits
    b_pad = _round_up(B, tile)
    n_tiles = b_pad // tile
    z_p = jnp.pad(z, ((0, b_pad - B), (0, dims_p[0] - latent)))

    # --- explicit VMEM budget (v7x has only 64 MiB physical) -----------------
    weight_bytes = (sum(int(w.size) * w.dtype.itemsize for w in ws_p)
                    + sum(int(b.size) * b.dtype.itemsize for b in bs_p))
    io_bytes = 2 * tile * (dims_p[0] + dims_p[-1]) * 4   # double-buffered z/out tiles
    act_bytes = 2 * tile * max(dims_p) * 4               # live activations
    vmem_limit = int(min(max(2 * (weight_bytes + io_bytes + act_bytes),
                             16 * 1024 * 1024),
                         48 * 1024 * 1024))

    try:
        out_p = _decoder_call(z_p, ws_p, bs_p, dims_p, tile, n_tiles,
                              vmem_limit, single_buffer_weights=True)
    except Exception:
        # pipeline_mode=pl.Buffered(1) not supported on this jax version:
        # fall back to default double-buffered weight blocks (correct, just
        # uses a bit more VMEM).
        out_p = _decoder_call(z_p, ws_p, bs_p, dims_p, tile, n_tiles,
                              vmem_limit, single_buffer_weights=False)

    return out_p[:B, :out_dims[-1]]


# -----------------------------------------------------------------------------
# Parameter construction + pure-JAX reference (identical numerics).
# -----------------------------------------------------------------------------
def make_meanfield_linear_params(key, in_dim, out_dim, init_std=0.001):
    """MeanFieldLinear variational params plus the eps draw for this forward.
    (The PyTorch layer draws eps inside forward; here the draw is an explicit
    input so the forward is a deterministic function.)"""
    k_mu_w, k_mu_b, k_eps_w, k_eps_b = jax.random.split(key, 4)
    bound = 1.0 / math.sqrt(in_dim)
    rho_val = math.log(math.expm1(init_std))          # inverse softplus
    return {
        "w_mu": jax.random.uniform(k_mu_w, (in_dim, out_dim),
                                   minval=-bound, maxval=bound, dtype=jnp.float32),
        "w_rho": jnp.full((in_dim, out_dim), rho_val, dtype=jnp.float32),
        "eps_w": jax.random.normal(k_eps_w, (in_dim, out_dim), dtype=jnp.float32),
        "b_mu": jax.random.uniform(k_mu_b, (1, out_dim),
                                   minval=-bound, maxval=bound, dtype=jnp.float32),
        "b_rho": jnp.full((1, out_dim), rho_val, dtype=jnp.float32),
        "eps_b": jax.random.normal(k_eps_b, (1, out_dim), dtype=jnp.float32),
    }


def reference_forward(z, layer_params):
    """Pure-JAX reference with matching numerics (bf16 sampled W, bf16
    inter-layer activations, f32 accumulation / bias / relu)."""
    h = z.astype(jnp.bfloat16)
    y = None
    for i, p in enumerate(layer_params):
        w = (p["w_mu"] + _softplus(p["w_rho"]) * p["eps_w"]).astype(jnp.bfloat16)
        b = p["b_mu"] + _softplus(p["b_rho"]) * p["eps_b"]
        y = jnp.dot(h, w, preferred_element_type=jnp.float32) + b
        if i < len(layer_params) - 1:
            h = jnp.maximum(y, 0.0).astype(jnp.bfloat16)
    return y


if __name__ == "__main__":
    # Small shapes consistent with the module layout, scaled down from
    # (latent=50, hidden=500, output=784).  latent=50 is the real module
    # latent size; the non-aligned dims exercise the padding path
    # (50 -> 128, 120 -> 128, 200 -> 256).
    batch = 64
    latent_size = 50
    hidden_size = 120
    output_size = 200
    init_std = 0.001

    key = jax.random.PRNGKey(0)
    kz, k0, k1, k2, k3 = jax.random.split(key, 5)
    z = jax.random.normal(kz, (batch, latent_size), dtype=jnp.float32)

    # layer_params[0:2] = task_layers[current_task]; [2:4] = shared_layers.
    layer_params = [
        make_meanfield_linear_params(k0, latent_size, hidden_size, init_std),
        make_meanfield_linear_params(k1, hidden_size, hidden_size, init_std),
        make_meanfield_linear_params(k2, hidden_size, hidden_size, init_std),
        make_meanfield_linear_params(k3, hidden_size, output_size, init_std),
    ]

    x_logits = decoder_forward(z, layer_params)
    x_logits = jax.block_until_ready(x_logits)

    ref = reference_forward(z, layer_params)
    assert x_logits.shape == (batch, output_size)
    max_err = float(jnp.max(jnp.abs(x_logits - ref)))
    assert jnp.allclose(x_logits, ref, atol=2e-2, rtol=2e-2), max_err

    # TODO(synk): kl_loss / store_params_as_old / forward_mean / add_task_layer
    # are training-time or bookkeeping utilities outside the forward hot path
    # and are not ported to Pallas.
    print("KERNEL_OK")
</pallas_src>

<mosaic_0001>
module attributes {stable_mosaic.version = 11 : i64} {
  func.func @_sample_layer_kernel(%arg0: memref<50x120xf32, #tpu.memory_space<vmem>>, %arg1: memref<50x120xf32, #tpu.memory_space<vmem>>, %arg2: memref<50x120xf32, #tpu.memory_space<vmem>>, %arg3: memref<1x120xf32, #tpu.memory_space<vmem>>, %arg4: memref<1x120xf32, #tpu.memory_space<vmem>>, %arg5: memref<1x120xf32, #tpu.memory_space<vmem>>, %arg6: memref<50x120xbf16, #tpu.memory_space<vmem>>, %arg7: memref<1x120xf32, #tpu.memory_space<vmem>>) attributes {dimension_semantics = [], scalar_prefetch = 0 : i64, scratch_operands = 0 : i64, tpu.core_type = #tpu.core_type<tc>} {
    %c0 = arith.constant 0 : index
    %c0_0 = arith.constant 0 : index
    %0 = vector.load %arg0[%c0, %c0_0] : memref<50x120xf32, #tpu.memory_space<vmem>>, vector<50x120xf32>
    %c0_1 = arith.constant 0 : index
    %c0_2 = arith.constant 0 : index
    %1 = vector.load %arg1[%c0_1, %c0_2] : memref<50x120xf32, #tpu.memory_space<vmem>>, vector<50x120xf32>
    %cst = arith.constant 0.000000e+00 : f32
    %2 = vector.broadcast %cst : f32 to vector<50x120xf32>
    %3 = arith.maximumf %1, %2 : vector<50x120xf32>
    %4 = math.absf %1 : vector<50x120xf32>
    %cst_3 = arith.constant 0.000000e+00 : f32
    %5 = vector.broadcast %cst_3 : f32 to vector<50x120xf32>
    %6 = arith.subf %5, %4 : vector<50x120xf32>
    %7 = math.exp %6 : vector<50x120xf32>
    %cst_4 = arith.constant 1.000000e+00 : f32
    %8 = vector.broadcast %cst_4 : f32 to vector<50x120xf32>
    %9 = arith.addf %8, %7 : vector<50x120xf32>
    %10 = math.log %9 : vector<50x120xf32>
    %11 = arith.addf %3, %10 : vector<50x120xf32>
    %c0_5 = arith.constant 0 : index
    %c0_6 = arith.constant 0 : index
    %12 = vector.load %arg2[%c0_5, %c0_6] : memref<50x120xf32, #tpu.memory_space<vmem>>, vector<50x120xf32>
    %13 = arith.mulf %11, %12 : vector<50x120xf32>
    %14 = arith.addf %0, %13 : vector<50x120xf32>
    %15 = arith.truncf %14 : vector<50x120xf32> to vector<50x120xbf16>
    %c0_7 = arith.constant 0 : index
    %c0_8 = arith.constant 0 : index
    %16 = vector.load %arg6[%c0_7, %c0_8] : memref<50x120xbf16, #tpu.memory_space<vmem>>, vector<50x120xbf16>
    tpu.vector_store %arg6[%c0_7, %c0_8], %15 {strides = array<i32>} : memref<50x120xbf16, #tpu.memory_space<vmem>>, vector<50x120xbf16>,
    %c0_9 = arith.constant 0 : index
    %c0_10 = arith.constant 0 : index
    %17 = vector.load %arg3[%c0_9, %c0_10] : memref<1x120xf32, #tpu.memory_space<vmem>>, vector<1x120xf32>
    %c0_11 = arith.constant 0 : index
    %c0_12 = arith.constant 0 : index
    %18 = vector.load %arg4[%c0_11, %c0_12] : memref<1x120xf32, #tpu.memory_space<vmem>>, vector<1x120xf32>
    %cst_13 = arith.constant 0.000000e+00 : f32
    %19 = vector.broadcast %cst_13 : f32 to vector<1x120xf32>
    %20 = arith.maximumf %18, %19 : vector<1x120xf32>
    %21 = math.absf %18 : vector<1x120xf32>
    %cst_14 = arith.constant 0.000000e+00 : f32
    %22 = vector.broadcast %cst_14 : f32 to vector<1x120xf32>
    %23 = arith.subf %22, %21 : vector<1x120xf32>
    %24 = math.exp %23 : vector<1x120xf32>
    %cst_15 = arith.constant 1.000000e+00 : f32
    %25 = vector.broadcast %cst_15 : f32 to vector<1x120xf32>
    %26 = arith.addf %25, %24 : vector<1x120xf32>
    %27 = math.log %26 : vector<1x120xf32>
    %28 = arith.addf %20, %27 : vector<1x120xf32>
    %c0_16 = arith.constant 0 : index
    %c0_17 = arith.constant 0 : index
    %29 = vector.load %arg5[%c0_16, %c0_17] : memref<1x120xf32, #tpu.memory_space<vmem>>, vector<1x120xf32>
    %30 = arith.mulf %28, %29 : vector<1x120xf32>
    %31 = arith.addf %17, %30 : vector<1x120xf32>
    %c0_18 = arith.constant 0 : index
    %c0_19 = arith.constant 0 : index
    %32 = vector.load %arg7[%c0_18, %c0_19] : memref<1x120xf32, #tpu.memory_space<vmem>>, vector<1x120xf32>
    tpu.vector_store %arg7[%c0_18, %c0_19], %31 {strides = array<i32>} : memref<1x120xf32, #tpu.memory_space<vmem>>, vector<1x120xf32>,
    return
  }
}

</mosaic_0001>

<bundles_post_ra>
// kernel: tpu_custom_call.1
= control target key start
LH: loop header
LB: loop body
LE: loop exit
PB: predicated region body
PF: predicated region fallthrough
CT: control target
= control target key end

     0   :  { %13 = vsyncpa [#allocation3], 0  ;;  %s519_s0 = inlined_call_operand.hbm [shape: f32[50,120], index: 0, kind: input, shape index: {}]   ;;  %s520_s1 = inlined_call_operand.hbm [shape: f32[50,120], index: 1, kind: input, shape index: {}]   ;;  %s521_s2 = inlined_call_operand.hbm [shape: f32[50,120], index: 2, kind: input, shape index: {}]   ;;  %s522_s3 = inlined_call_operand.vmem [shape: f32[1,120], index: 3, kind: input, shape index: {}]   ;;  %s523_s4 = inlined_call_operand.vmem [shape: f32[1,120], index: 4, kind: input, shape index: {}]   ;;  %s524_s5 = inlined_call_operand.vmem [shape: f32[1,120], index: 5, kind: input, shape index: {}]   ;;  %s525_s6 = inlined_call_operand.hbm [shape: bf16[50,120], index: 6, kind: output, shape index: {0}]   ;;  %s526_s7 = inlined_call_operand.hbm [shape: f32[1,120], index: 7, kind: output, shape index: {1}]  }
   0x1   :  { %14 = vsyncpa [#allocation6], 0 }
   0x2   :  { %15 = vsyncpa [#allocation4], 0 }
   0x3   :  { %16 = vsyncpa [#allocation10], 0  ;;  %s34_s26 = sshll.u32 %s520_s1, 4  ;;  %s408_s27 = smov [#allocation5]   ;;  %s35_s26 = int_to_ptr.hbm [resolvable:$true] %s34_s26 }
   0x4   :  { %s36_s28 = sshll.u32 %s408_s27, 4  ;;  %s21_s8 = sshll.u32 %s519_s0, 4  ;;  %s37_s28 = int_to_ptr.vmem [resolvable:$true] %s36_s28  ;;  %s22_s8 = int_to_ptr.hbm [resolvable:$true] %s21_s8 }
   0x5   :  { %s409_s9 = smov 128   ;;  %s410_s10 = smov 8  }
   0x6   :  { %42 = dma.hbm_to_vmem [thread:$0]  %s35_s26, 896, %s37_s28, [#allocation6], %s409_s9, %s409_s9, %s410_s10  }
   0x7   :  { %s411_s11 = smov [#allocation2]   ;;  %s47_s15 = sshll.u32 %s521_s2, 4  ;;  %s48_s15 = int_to_ptr.hbm [resolvable:$true] %s47_s15 }
   0x8   :  { %s23_s12 = sshll.u32 %s411_s11, 4  ;;  %s412_s1 = smov [#allocation7]   ;;  %s24_s12 = int_to_ptr.vmem [resolvable:$true] %s23_s12 }
   0x9   :  { %29 = dma.hbm_to_vmem [thread:$0]  %s22_s8, 896, %s24_s12, [#allocation3], %s409_s9, %s409_s9, %s410_s10  }
   0xa   :  { %s49_s16 = sshll.u32 %s412_s1, 4  ;;  %s50_s16 = int_to_ptr.vmem [resolvable:$true] %s49_s16 }
   0xb   :  { %55 = dma.hbm_to_vmem [thread:$0]  %s48_s15, 896, %s50_s16, [#allocation6], %s409_s9, %s409_s9, %s410_s10  }
   0xc   :  { %400 = dma.done.wait [#allocation3], 896  }
   0xd   :  { %401 = vsyncadd [#allocation3], 4294966400 }
   0xe   :  { %402 = dma.done.wait [#allocation6], 1792  }
   0xf   :  { %403 = vsyncadd [#allocation6], 4294965504  ;;  %v466_v0 = vld [vmem:[#allocation5] sm:$0xff]  ;;  %v469_v2 = vld [vmem:[#allocation5 + $0x8] sm:$0xff]  ;;  %vm179_vm0 = vcmask 977920   ;;  %s413_s18 = smov [#allocation8]  }
  0x10   :  { %v95_v1 = vand.u32 2147483647, %v466_v0  ;;  %v96_v3 = vand.u32 2147483647, %v469_v2  ;;  %v472_v4 = vld [vmem:[#allocation5 + $0x10] sm:$0xff]  ;;  %v475_v7 = vld [vmem:[#allocation5 + $0x18] sm:$0xff] }
  0x11   :  { %v97_v6 = vand.u32 2147483647, %v472_v4  ;;  %v98_v9 = vand.u32 2147483647, %v475_v7  ;;  %v478_v12 = vld [vmem:[#allocation5 + $0x20] sm:$0xff]  ;;  %v481_v17 = vld [vmem:[#allocation5 + $0x28] sm:$0xff] }
  0x12   :  { %v102_v5 = vsub.f32 0.0, %v95_v1  ;;  %v103_v8 = vsub.f32 0.0, %v96_v3  ;;  %v99_v15 = vand.u32 2147483647, %v478_v12  ;;  %v483_v20 = vld [vmem:[#allocation5 + $0x30] sm:$0x3] }
  0x13   :  { %v104_v11 = vsub.f32 0.0, %v97_v6  ;;  %v105_v14 = vsub.f32 0.0, %v98_v9  ;;  %v100_v21 = vand.u32 2147483647, %v481_v17  ;;  %v101_v22 = vand.u32 2147483647, %v483_v20 }
  0x14   :  { %v109_v10 = vmul.f32 1.442695, %v102_v5  ;;  %v111_v13 = vmul.f32 1.442695, %v103_v8  ;;  %v106_v19 = vsub.f32 0.0, %v99_v15  ;;  %v88_v43 = vmax.f32 %v466_v0, 0.0 }
  0x15   :  { %v113_v16 = vmul.f32 1.442695, %v104_v11  ;;  %v115_v18 = vmul.f32 1.442695, %v105_v14  ;;  %v490_v24 = vld [vmem:[%s523_s4] sm:$0x1] }
  0x16   :  { %248 = vpow2.f32 %v109_v10  ;;  %v117_v23 = vmul.f32 1.442695, %v106_v19  ;;  %v107_v25 = vsub.f32 0.0, %v100_v21  ;;  %v108_v26 = vsub.f32 0.0, %v101_v22  ;;  %v151_v51 = vld [vmem:[#allocation7] sm:$0xff]  ;;  %v152_v56 = vld [vmem:[#allocation7 + $0x8] sm:$0xff] }
  0x17   :  { %250 = vpow2.f32 %v111_v13  ;;  %v191_v27 = vand.u32 2147483647, %v490_v24  ;;  %v89_v45 = vmax.f32 %v469_v2, 0.0  ;;  %v90_v49 = vmax.f32 %v472_v4, 0.0  ;;  %v74_v59 = vld [vmem:[#allocation2] sm:$0xff]  ;;  %v75_v2 = vld [vmem:[#allocation2 + $0x8] sm:$0xff] }
  0x18   :  { %252 = vpow2.f32 %v113_v16  ;;  %v119_v29 = vmul.f32 1.442695, %v107_v25  ;;  %v121_v37 = vmul.f32 1.442695, %v108_v26  ;;  %v91_v53 = vmax.f32 %v475_v7, 0.0  ;;  %v153_v61 = vld [vmem:[#allocation7 + $0x10] sm:$0xff] }
  0x19   :  { %254 = vpow2.f32 %v115_v18  ;;  %v192_v32 = vsub.f32 0.0, %v191_v27  ;;  %v92_v63 = vmax.f32 %v478_v12, 0.0  ;;  %v154_v4 = vld [vmem:[#allocation7 + $0x18] sm:$0xff]  ;;  %v76_v8 = vld [vmem:[#allocation2 + $0x10] sm:$0xff]  ;;  %v93_v11 = vmax.f32 %v481_v17, 0.0  ;;  %v77_v15 = vld [vmem:[#allocation2 + $0x18] sm:$0xff] }
  0x1a   :  { %256 = vpow2.f32 %v117_v23  ;;  %v155_v16 = vld [vmem:[#allocation7 + $0x20] sm:$0xff]  ;;  %v78_v26 = vld [vmem:[#allocation2 + $0x20] sm:$0xff]  ;;  %v156_v17 = vld [vmem:[#allocation7 + $0x28] sm:$0xff]  ;;  %s207_s19 = sshll.u32 %s413_s18, 4  ;;  %s209_s22 = sshll.u32 %s525_s6, 4  ;;  %vm186_vm1 = vcmask 974848   ;;  %s208_s19 = int_to_ptr.vmem [resolvable:$true] %s207_s19  ;;  %s210_s22 = int_to_ptr.hbm [resolvable:$true] %s209_s22 }
  0x1b   :  { %258 = vpow2.f32 %v119_v29  ;;  %v193_v40 = vmul.f32 1.442695, %v192_v32  ;;  %s414_s25 = smov [#allocation9]   ;;  %s223_s28 = sshll.u32 %s526_s7, 4  ;;  %s224_s28 = int_to_ptr.hbm [resolvable:$true] %s223_s28 }
  0x1c   :  { %v249_v28 = vpop.eup %248  ;;  %s221_s26 = sshll.u32 %s414_s25, 4  ;;  %s415_s6 = smov 64   ;;  %s222_s26 = int_to_ptr.vmem [resolvable:$true] %s221_s26 }
  0x1d   :  { %v251_v30 = vpop.eup %250  ;;  %v123_v31 = vadd.f32 1.0, %v249_v28  ;;  %s416_s29 = smov 4  }
  0x1e   :  { %v253_v33 = vpop.eup %252  ;;  %v124_v34 = vadd.f32 1.0, %v251_v30 }
  0x1f   :  { %v255_v35 = vpop.eup %254  ;;  %260 = vlog2.f32 %v123_v31  ;;  %v125_v36 = vadd.f32 1.0, %v253_v33 }
  0x20   :  { %262 = vlog2.f32 %v124_v34  ;;  %v126_v38 = vadd.f32 1.0, %v255_v35  ;;  %v257_v39 = vpop.eup %256  ;;  %v79_v35 = vld [vmem:[#allocation2 + $0x28] sm:$0xff] }
  0x21   :  { %264 = vlog2.f32 %v125_v36  ;;  %v127_v41 = vadd.f32 1.0, %v257_v39  ;;  %v259_v42 = vpop.eup %258  ;;  %v94_v36 = vmax.f32 %v483_v20, 0.0  ;;  %v199_v20 = vld [vmem:[%s524_s5] sm:$0x1] }
  0x22   :  { %266 = vlog2.f32 %v126_v38  ;;  %v128_v46 = vadd.f32 1.0, %v259_v42 }
  0x23   :  { %268 = vpow2.f32 %v121_v37 }
  0x24   :  { %270 = vlog2.f32 %v127_v41  ;;  %v190_v41 = vmax.f32 %v490_v24, 0.0  ;;  %v188_v24 = vld [vmem:[%s522_s3] sm:$0x1] }
  0x25   :  { %v261_v44 = vpop.eup %260  ;;  %272 = vpow2.f32 %v193_v40 }
  0x26   :  { %v263_v47 = vpop.eup %262  ;;  %v131_v48 = vmul.f32 0.6931472, %v261_v44  ;;  %274 = vlog2.f32 %v128_v46  ;;  %v157_v44 = vld [vmem:[#allocation7 + $0x30] sm:$0x3] }
  0x27   :  { %v265_v50 = vpop.eup %264  ;;  %v133_v52 = vmul.f32 0.6931472, %v263_v47 }
  0x28   :  { %v267_v54 = vpop.eup %266  ;;  %v144_v55 = vadd.f32 %v131_v48, %v88_v43  ;;  %v135_v57 = vmul.f32 0.6931472, %v265_v50  ;;  %v80_v48 = vld [vmem:[#allocation2 + $0x30] sm:$0x3] }
  0x29   :  { %v269_v58 = vpop.eup %268  ;;  %v145_v60 = vadd.f32 %v133_v52, %v89_v45  ;;  %v137_v62 = vmul.f32 0.6931472, %v267_v54 }
  0x2a   :  { %v271_v0 = vpop.eup %270  ;;  %v158_v1 = vmul.f32 %v151_v51, %v144_v55  ;;  %v146_v3 = vadd.f32 %v135_v57, %v90_v49  ;;  %v129_v5 = vadd.f32 1.0, %v269_v58 }
  0x2b   :  { %v273_v6 = vpop.eup %272  ;;  %v159_v7 = vmul.f32 %v152_v56, %v145_v60  ;;  %v147_v9 = vadd.f32 %v137_v62, %v91_v53  ;;  %v139_v10 = vmul.f32 0.6931472, %v271_v0 }
  0x2c   :  { %v165_v13 = vadd.f32 %v158_v1, %v74_v59  ;;  %v160_v14 = vmul.f32 %v153_v61, %v146_v3  ;;  %276 = vlog2.f32 %v129_v5  ;;  %v195_v18 = vadd.f32 1.0, %v273_v6  ;;  %v275_v12 = vpop.eup %274 }
  0x2d   :  { %v166_v19 = vadd.f32 %v159_v7, %v75_v2  ;;  %v161_v21 = vmul.f32 %v154_v4, %v147_v9  ;;  %v148_v22 = vadd.f32 %v139_v10, %v92_v63  ;;  %v141_v27 = vmul.f32 0.6931472, %v275_v12 }
  0x2e   :  { %v172_v23 = vpack.c.bf16 %v165_v13, %v165_v13  ;;  %v167_v25 = vadd.f32 %v160_v14, %v76_v8  ;;  %278 = vlog2.f32 %v195_v18 }
  0x2f   :  { %v173_v28 = vpack.c.bf16 %v166_v19, %v166_v19  ;;  %v168_v29 = vadd.f32 %v161_v21, %v77_v15  ;;  %v162_v30 = vmul.f32 %v155_v16, %v148_v22  ;;  %v149_v32 = vadd.f32 %v141_v27, %v93_v11 }
  0x30   :  { %180 = vst.msk [vmem:[#allocation8] sm:$0xf] %vm179_vm0, %v172_v23  ;;  %v174_v31 = vpack.c.bf16 %v167_v25, %v167_v25 }
  0x31   :  { %181 = vst.msk [vmem:[#allocation8 + $0x4] sm:$0xf] %vm179_vm0, %v173_v28  ;;  %v175_v33 = vpack.c.bf16 %v168_v29, %v168_v29  ;;  %v169_v34 = vadd.f32 %v162_v30, %v78_v26  ;;  %v163_v38 = vmul.f32 %v156_v17, %v149_v32 }
  0x32   :  { %v277_v37 = vpop.eup %276  ;;  %182 = vst.msk [vmem:[#allocation8 + $0x8] sm:$0xf] %vm179_vm0, %v174_v31 }
  0x33   :  { %183 = vst.msk [vmem:[#allocation8 + $0xc] sm:$0xf] %vm179_vm0, %v175_v33  ;;  %v176_v39 = vpack.c.bf16 %v169_v34, %v169_v34  ;;  %v143_v40 = vmul.f32 0.6931472, %v277_v37  ;;  %v170_v43 = vadd.f32 %v163_v38, %v79_v35 }
  0x34   :  { %v279_v42 = vpop.eup %278 }
  0x35   :  { %184 = vst.msk [vmem:[#allocation8 + $0x10] sm:$0xf] %vm179_vm0, %v176_v39  ;;  %v150_v45 = vadd.f32 %v143_v40, %v94_v36  ;;  %v197_v46 = vmul.f32 0.6931472, %v279_v42  ;;  %v177_v47 = vpack.c.bf16 %v170_v43, %v170_v43 }
  0x37   :  { %v164_v49 = vmul.f32 %v157_v44, %v150_v45  ;;  %v198_v50 = vadd.f32 %v197_v46, %v190_v41  ;;  %185 = vst.msk [vmem:[#allocation8 + $0x14] sm:$0xf] %vm179_vm0, %v177_v47 }
  0x39   :  { %v171_v51 = vadd.f32 %v164_v49, %v80_v48  ;;  %v200_v52 = vmul.f32 %v199_v20, %v198_v50 }
  0x3b   :  { %v178_v53 = vpack.c.bf16 %v171_v51, %v171_v51  ;;  %v201_v54 = vadd.f32 %v200_v52, %v188_v24 }
  0x3d   :  { %187 = vst.msk [vmem:[#allocation8 + $0x18] sm:$0x1] %vm186_vm1, %v178_v53 }
  0x3e   :  { %202 = vst.msk [vmem:[#allocation9] sm:$0x1] %vm186_vm1, %v201_v54  ;;  %215 = dma.vmem_to_hbm [thread:$0]  %s208_s19, 448, %s210_s22, [#allocation4], %s415_s6, %s415_s6, %s416_s29  }
  0x3f   :  { %226 = dma.vmem_to_hbm [thread:$0]  %s222_s26, 16, %s224_s28, [#allocation10]  }
  0x40   :  { %404 = dma.done.wait [#allocation4], 448  }
  0x41   :  { %405 = vsyncadd [#allocation4], 4294966848 }
  0x42   :  { %406 = dma.done.wait [#allocation10], 16  }
  0x43   :  { %407 = vsyncadd [#allocation10], 4294967280 }
  0x44   :  { %235 = vsyncpa [#allocation3], 1 }
  0x45   :  { %236 = vsyncpa [#allocation6], 1 }
  0x46   :  { %237 = vsyncpa [#allocation4], 1 }
  0x47   :  { %238 = vsyncpa [#allocation10], 1 }

</bundles_post_ra>
